<compile_context>
chip_gen: v6e
topology: v6e:2x2x1
jax: 0.10.0
libtpu: 0.0.40
codegen_flags: <defaults>
</compile_context>

<pallas_src>
import functools

import jax
import jax.numpy as jnp
from jax.experimental import pallas as pl
from jax.experimental.pallas import tpu as pltpu

LANE = 128


def _round_up(n, m):
    return ((n + m - 1) // m) * m


def dqn_kernel(x_ref, w1_ref, b1_ref, w2_ref, b2_ref, w3_ref, b3_ref, o_ref, *,
               out_dim):
    # Cast the f32 input tile to bf16 in-kernel (avoids a wrapper-side XLA pass).
    x = x_ref[...].astype(w1_ref.dtype)
    # fc1 + ReLU (bf16 MXU matmul, f32 accumulate / bias / ReLU)
    h1 = jnp.dot(x, w1_ref[...], preferred_element_type=jnp.float32)
    h1 = jnp.maximum(h1 + b1_ref[...], 0.0)
    # fc2 + ReLU
    h2 = jnp.dot(h1.astype(w2_ref.dtype), w2_ref[...],
                 preferred_element_type=jnp.float32)
    h2 = jnp.maximum(h2 + b2_ref[...], 0.0)
    # fc3 (no activation). w3/b3 are lane-padded to 128 for MXU-friendly compute;
    # only the real out_dim columns are written back to HBM.
    y = jnp.dot(h2.astype(w3_ref.dtype), w3_ref[...],
                preferred_element_type=jnp.float32) + b3_ref[...]
    o_ref[...] = y[:, :out_dim].astype(o_ref.dtype)


def prepare_params(params, compute_dtype=jnp.bfloat16):
    """One-time weight prep, hoisted out of the per-step forward:
    weights cast to bf16, biases kept f32, final layer lane-padded to 128."""
    w1, b1, w2, b2, w3, b3 = params
    out_dim = w3.shape[1]
    out_pad = _round_up(out_dim, LANE)
    if out_pad != out_dim:
        w3 = jnp.pad(w3, ((0, 0), (0, out_pad - out_dim)))
        b3 = jnp.pad(b3, ((0, 0), (0, out_pad - out_dim)))
    w1c, w2c, w3c = (w.astype(compute_dtype) for w in (w1, w2, w3))
    b1f, b2f, b3f = (b.astype(jnp.float32).reshape(1, -1) for b in (b1, b2, b3))
    return (w1c, b1f, w2c, b2f, w3c, b3f), out_dim


def dqn_forward(x, prepared, out_dim, *, batch_tile=1024):
    """x: (batch, input_dim) f32. prepared: output of prepare_params."""
    w1, b1, w2, b2, w3, b3 = prepared
    batch, input_dim = x.shape
    hidden = w1.shape[1]
    out_pad = w3.shape[1]

    # Batch tile: large (amortizes per-grid-step overhead, ~HBM roofline), but
    # clamped so the grid has >= 2 steps when batch allows (v7x dual-TC sharding).
    if batch <= 8:
        tb = batch                           # block == full dim: always legal
    else:
        tb = min(batch_tile, _round_up(pl.cdiv(batch, 2), 8))
    grid = (pl.cdiv(batch, tb),)             # ragged last block handled by Pallas

    # Weights/biases: constant index_map -> one DMA, VMEM-resident across tiles.
    def resident(a):
        return pl.BlockSpec(a.shape, lambda i: (0,) * a.ndim)

    nbytes = lambda a: a.size * a.dtype.itemsize
    cost = pl.CostEstimate(
        flops=2 * batch * (input_dim * hidden + hidden * hidden + hidden * out_pad),
        transcendentals=0,
        bytes_accessed=(nbytes(x)
                        + sum(nbytes(a) for a in (w1, b1, w2, b2, w3, b3))
                        + batch * out_dim * 4),
    )

    kernel = functools.partial(dqn_kernel, out_dim=out_dim)

    return pl.pallas_call(
        kernel,
        out_shape=jax.ShapeDtypeStruct((batch, out_dim), jnp.float32),
        grid=grid,
        in_specs=[
            pl.BlockSpec((tb, input_dim), lambda i: (i, 0)),  # x: tiled over batch
            resident(w1), resident(b1),
            resident(w2), resident(b2),
            resident(w3), resident(b3),
        ],
        # Output block last dim == full array dim (legal); only real columns hit HBM.
        out_specs=pl.BlockSpec((tb, out_dim), lambda i: (i, 0)),
        compiler_params=pltpu.CompilerParams(
            dimension_semantics=("parallel",),   # independent batch tiles
            vmem_limit_bytes=32 * 1024 * 1024,   # safe on v5e/v6e/v7x at tb<=4096
        ),
        cost_estimate=cost,
    )(x, w1, b1, w2, b2, w3, b3)


def init_linear(key, fan_in, fan_out):
    # Matches torch.nn.Linear default init: U(-1/sqrt(fan_in), 1/sqrt(fan_in)).
    kw, kb = jax.random.split(key)
    bound = 1.0 / jnp.sqrt(fan_in)
    # Stored as (in, out) so the kernel computes x @ W (== torch's x @ W.T).
    w = jax.random.uniform(kw, (fan_in, fan_out), jnp.float32, -bound, bound)
    b = jax.random.uniform(kb, (1, fan_out), jnp.float32, -bound, bound)
    return w, b


def dqn_reference_bf16(x, params, compute_dtype=jnp.bfloat16):
    # Mirrors the kernel's dtype path (bf16 matmuls, f32 accum/bias/ReLU).
    w1, b1, w2, b2, w3, b3 = params
    h = jnp.dot(x.astype(compute_dtype), w1.astype(compute_dtype),
                preferred_element_type=jnp.float32)
    h = jnp.maximum(h + b1, 0.0)
    h = jnp.dot(h.astype(compute_dtype), w2.astype(compute_dtype),
                preferred_element_type=jnp.float32)
    h = jnp.maximum(h + b2, 0.0)
    return jnp.dot(h.astype(compute_dtype), w3.astype(compute_dtype),
                   preferred_element_type=jnp.float32) + b3


def dqn_reference_f32(x, params):
    w1, b1, w2, b2, w3, b3 = params
    h = jnp.maximum(x @ w1 + b1, 0.0)
    h = jnp.maximum(h @ w2 + b2, 0.0)
    return h @ w3 + b3


if __name__ == "__main__":
    batch, input_dim, hidden, output_dim = 8, 32, 128, 8

    key = jax.random.PRNGKey(0)
    k_x, k1, k2, k3 = jax.random.split(key, 4)

    x = jax.random.normal(k_x, (batch, input_dim), jnp.float32)
    w1, b1 = init_linear(k1, input_dim, hidden)
    w2, b2 = init_linear(k2, hidden, hidden)
    w3, b3 = init_linear(k3, hidden, output_dim)
    params = (w1, b1, w2, b2, w3, b3)

    prepared, out_dim = prepare_params(params)   # one-time weight prep
    out = dqn_forward(x, prepared, out_dim)
    out = jax.block_until_ready(out)
    assert out.shape == (batch, output_dim)

    # Check against a reference that follows the same bf16/f32 dtype path.
    ref_bf16 = dqn_reference_bf16(x, params)
    assert jnp.allclose(out, ref_bf16, atol=5e-3, rtol=5e-3), "mismatch vs bf16 reference"

    # Loose sanity check against the pure-f32 math of the original module.
    ref_f32 = dqn_reference_f32(x, params)
    assert jnp.allclose(out, ref_f32, atol=5e-2, rtol=5e-2), "mismatch vs f32 reference"

    print("KERNEL_OK")
</pallas_src>

<mosaic_0001>
module attributes {stable_mosaic.version = 11 : i64} {
  func.func @dqn_kernel(%arg0: i32, %arg1: memref<8x32xf32, #tpu.memory_space<vmem>>, %arg2: memref<32x128xbf16, #tpu.memory_space<vmem>>, %arg3: memref<1x128xf32, #tpu.memory_space<vmem>>, %arg4: memref<128x128xbf16, #tpu.memory_space<vmem>>, %arg5: memref<1x128xf32, #tpu.memory_space<vmem>>, %arg6: memref<128x128xbf16, #tpu.memory_space<vmem>>, %arg7: memref<1x128xf32, #tpu.memory_space<vmem>>, %arg8: memref<8x8xf32, #tpu.memory_space<vmem>>) attributes {dimension_semantics = [#tpu.dimension_semantics<parallel>], iteration_bounds = array<i64: 1>, scalar_prefetch = 0 : i64, scratch_operands = 0 : i64, tpu.core_type = #tpu.core_type<tc>, window_params = [{transform_indices = @transform_0, window_bounds = array<i64: 8, 32>}, {pipeline_mode = #tpu.pipeline_mode<synchronous>, transform_indices = @transform_1, window_bounds = array<i64: 32, 128>}, {pipeline_mode = #tpu.pipeline_mode<synchronous>, transform_indices = @transform_2, window_bounds = array<i64: 1, 128>}, {pipeline_mode = #tpu.pipeline_mode<synchronous>, transform_indices = @transform_3, window_bounds = array<i64: 128, 128>}, {pipeline_mode = #tpu.pipeline_mode<synchronous>, transform_indices = @transform_4, window_bounds = array<i64: 1, 128>}, {pipeline_mode = #tpu.pipeline_mode<synchronous>, transform_indices = @transform_5, window_bounds = array<i64: 128, 128>}, {pipeline_mode = #tpu.pipeline_mode<synchronous>, transform_indices = @transform_6, window_bounds = array<i64: 1, 128>}, {transform_indices = @transform_7, window_bounds = array<i64: 8, 8>}]} {
    %c0 = arith.constant 0 : index
    %c0_0 = arith.constant 0 : index
    %0 = vector.load %arg1[%c0, %c0_0] : memref<8x32xf32, #tpu.memory_space<vmem>>, vector<8x32xf32>
    %1 = arith.truncf %0 : vector<8x32xf32> to vector<8x32xbf16>
    %c0_1 = arith.constant 0 : index
    %c0_2 = arith.constant 0 : index
    %2 = vector.load %arg2[%c0_1, %c0_2] : memref<32x128xbf16, #tpu.memory_space<vmem>>, vector<32x128xbf16>
    %cst = arith.constant dense<0.000000e+00> : vector<8x128xf32>
    %3 = tpu.matmul %1, %2, %cst {dimension_numbers = #tpu.dot_dimension_numbers<[1], [0], [0], [1], [0, 0, 1, 1], [], []>} : vector<8x32xbf16>, vector<32x128xbf16>, vector<8x128xf32> -> vector<8x128xf32>
    %c0_3 = arith.constant 0 : index
    %c0_4 = arith.constant 0 : index
    %4 = vector.load %arg3[%c0_3, %c0_4] : memref<1x128xf32, #tpu.memory_space<vmem>>, vector<1x128xf32>
    %5 = vector.broadcast %4 : vector<1x128xf32> to vector<8x128xf32>
    %6 = arith.addf %3, %5 : vector<8x128xf32>
    %cst_5 = arith.constant 0.000000e+00 : f32
    %7 = vector.broadcast %cst_5 : f32 to vector<8x128xf32>
    %8 = arith.maximumf %6, %7 : vector<8x128xf32>
    %9 = arith.truncf %8 : vector<8x128xf32> to vector<8x128xbf16>
    %c0_6 = arith.constant 0 : index
    %c0_7 = arith.constant 0 : index
    %10 = vector.load %arg4[%c0_6, %c0_7] : memref<128x128xbf16, #tpu.memory_space<vmem>>, vector<128x128xbf16>
    %cst_8 = arith.constant dense<0.000000e+00> : vector<8x128xf32>
    %11 = tpu.matmul %9, %10, %cst_8 {dimension_numbers = #tpu.dot_dimension_numbers<[1], [0], [0], [1], [0, 0, 1, 1], [], []>} : vector<8x128xbf16>, vector<128x128xbf16>, vector<8x128xf32> -> vector<8x128xf32>
    %c0_9 = arith.constant 0 : index
    %c0_10 = arith.constant 0 : index
    %12 = vector.load %arg5[%c0_9, %c0_10] : memref<1x128xf32, #tpu.memory_space<vmem>>, vector<1x128xf32>
    %13 = vector.broadcast %12 : vector<1x128xf32> to vector<8x128xf32>
    %14 = arith.addf %11, %13 : vector<8x128xf32>
    %cst_11 = arith.constant 0.000000e+00 : f32
    %15 = vector.broadcast %cst_11 : f32 to vector<8x128xf32>
    %16 = arith.maximumf %14, %15 : vector<8x128xf32>
    %17 = arith.truncf %16 : vector<8x128xf32> to vector<8x128xbf16>
    %c0_12 = arith.constant 0 : index
    %c0_13 = arith.constant 0 : index
    %18 = vector.load %arg6[%c0_12, %c0_13] : memref<128x128xbf16, #tpu.memory_space<vmem>>, vector<128x128xbf16>
    %cst_14 = arith.constant dense<0.000000e+00> : vector<8x128xf32>
    %19 = tpu.matmul %17, %18, %cst_14 {dimension_numbers = #tpu.dot_dimension_numbers<[1], [0], [0], [1], [0, 0, 1, 1], [], []>} : vector<8x128xbf16>, vector<128x128xbf16>, vector<8x128xf32> -> vector<8x128xf32>
    %c0_15 = arith.constant 0 : index
    %c0_16 = arith.constant 0 : index
    %20 = vector.load %arg7[%c0_15, %c0_16] : memref<1x128xf32, #tpu.memory_space<vmem>>, vector<1x128xf32>
    %21 = vector.broadcast %20 : vector<1x128xf32> to vector<8x128xf32>
    %22 = arith.addf %19, %21 : vector<8x128xf32>
    %23 = vector.extract_strided_slice %22 {offsets = [0, 0], sizes = [8, 8], strides = [1, 1]} : vector<8x128xf32> to vector<8x8xf32>
    %c0_17 = arith.constant 0 : index
    %c0_18 = arith.constant 0 : index
    %24 = vector.load %arg8[%c0_17, %c0_18] : memref<8x8xf32, #tpu.memory_space<vmem>>, vector<8x8xf32>
    tpu.vector_store %arg8[%c0_17, %c0_18], %23 {strides = array<i32>} : memref<8x8xf32, #tpu.memory_space<vmem>>, vector<8x8xf32>,
    return
  }
  func.func @transform_0(%arg0: i32) -> (i32, i32) {
    %c0_i32 = arith.constant 0 : i32
    %c0_i32_0 = arith.constant 0 : i32
    return %arg0, %c0_i32 : i32, i32
  }
  func.func @transform_1(%arg0: i32) -> (i32, i32) {
    %c0_i32 = arith.constant 0 : i32
    %c0_i32_0 = arith.constant 0 : i32
    %c0_i32_1 = arith.constant 0 : i32
    return %c0_i32, %c0_i32_0 : i32, i32
  }
  func.func @transform_2(%arg0: i32) -> (i32, i32) {
    %c0_i32 = arith.constant 0 : i32
    %c0_i32_0 = arith.constant 0 : i32
    %c0_i32_1 = arith.constant 0 : i32
    return %c0_i32, %c0_i32_0 : i32, i32
  }
  func.func @transform_3(%arg0: i32) -> (i32, i32) {
    %c0_i32 = arith.constant 0 : i32
    %c0_i32_0 = arith.constant 0 : i32
    %c0_i32_1 = arith.constant 0 : i32
    return %c0_i32, %c0_i32_0 : i32, i32
  }
  func.func @transform_4(%arg0: i32) -> (i32, i32) {
    %c0_i32 = arith.constant 0 : i32
    %c0_i32_0 = arith.constant 0 : i32
    %c0_i32_1 = arith.constant 0 : i32
    return %c0_i32, %c0_i32_0 : i32, i32
  }
  func.func @transform_5(%arg0: i32) -> (i32, i32) {
    %c0_i32 = arith.constant 0 : i32
    %c0_i32_0 = arith.constant 0 : i32
    %c0_i32_1 = arith.constant 0 : i32
    return %c0_i32, %c0_i32_0 : i32, i32
  }
  func.func @transform_6(%arg0: i32) -> (i32, i32) {
    %c0_i32 = arith.constant 0 : i32
    %c0_i32_0 = arith.constant 0 : i32
    %c0_i32_1 = arith.constant 0 : i32
    return %c0_i32, %c0_i32_0 : i32, i32
  }
  func.func @transform_7(%arg0: i32) -> (i32, i32) {
    %c0_i32 = arith.constant 0 : i32
    %c0_i32_0 = arith.constant 0 : i32
    return %arg0, %c0_i32 : i32, i32
  }
}

</mosaic_0001>

<bundles_post_ra>
// kernel: tpu_custom_call.1
= control target key start
LH: loop header
LB: loop body
LE: loop exit
PB: predicated region body
PF: predicated region fallthrough
CT: control target
= control target key end

     0   :  { %12 = vsyncpa [#allocation3], 0  ;;  %s727_s0 = inlined_call_operand.hbm [shape: f32[8,32], index: 0, kind: input, shape index: {}]   ;;  %s728_s1 = inlined_call_operand.hbm [shape: bf16[32,128], index: 1, kind: input, shape index: {}]   ;;  %s729_s2 = inlined_call_operand.vmem [shape: f32[1,128], index: 2, kind: input, shape index: {}]   ;;  %s730_s3 = inlined_call_operand.hbm [shape: bf16[128,128], index: 3, kind: input, shape index: {}]   ;;  %s731_s4 = inlined_call_operand.vmem [shape: f32[1,128], index: 4, kind: input, shape index: {}]   ;;  %s732_s5 = inlined_call_operand.hbm [shape: bf16[128,128], index: 5, kind: input, shape index: {}]   ;;  %s733_s6 = inlined_call_operand.vmem [shape: f32[1,128], index: 6, kind: input, shape index: {}]   ;;  %s734_s7 = inlined_call_operand.hbm [shape: f32[8,8], index: 7, kind: output, shape index: {}]  }
   0x1   :  { %13 = vsyncpa [#allocation6], 0 }
   0x2   :  { %14 = vsyncpa [#allocation9], 0 }
   0x3   :  { %15 = vsyncpa [#allocation4], 0  ;;  %s621_s24 = smov [#allocation5]  }
   0x4   :  { %s31_s25 = sshll.u32 %s621_s24, 4  ;;  %s32_s25 = int_to_ptr.vmem [resolvable:$true] %s31_s25 }
   0x5   :  { %s521_s26 = scalar_lea.vmem %s32_s25, 256  ;;  %p526_p1 = scmp.lt.s32.totalorder %s32_s25, %s32_s25 }
   0x6   :  { %p522_p0 = scmp.ne.s32.totalorder %s32_s25, %s521_s26  ;;  %p527_p2 = scmp.lt.s32.totalorder %s521_s26, %s521_s26 }
   0x8   :  { %p528_p3 = por %p527_p2, %p526_p1 }
   0xa   :  { %p529_p4 = pnand %p528_p3, %p522_p0 }
   0xc   :  { %532 = shalt.err (!%p529_p4)
}
   0xd   :  { %s622_s27 = smov 64   ;;  %s623_s28 = smov 4  }
   0xe   :  { %37 = dma.hbm_to_vmem [thread:$0]  %s728_s1, 256, %s32_s25, [#allocation6], %s622_s27, %s622_s27, %s623_s28  }
   0xf   :  { %s624_s8 = smov [#allocation2]   ;;  %s625_s10 = smov [#allocation7]  }
  0x10   :  { %s22_s9 = sshll.u32 %s624_s8, 4  ;;  %s45_s11 = sshll.u32 %s625_s10, 4  ;;  %s23_s9 = int_to_ptr.vmem [resolvable:$true] %s22_s9  ;;  %s46_s11 = int_to_ptr.vmem [resolvable:$true] %s45_s11 }
  0x11   :  { %s541_s12 = scalar_lea.vmem %s23_s9, 128  ;;  %p546_p6 = scmp.lt.s32.totalorder %s23_s9, %s23_s9 }
  0x12   :  { %p542_p5 = scmp.ne.s32.totalorder %s23_s9, %s541_s12  ;;  %p547_p7 = scmp.lt.s32.totalorder %s541_s12, %s541_s12 }
  0x14   :  { %p548_p8 = por %p547_p7, %p546_p6 }
  0x16   :  { %p549_p9 = pnand %p548_p8, %p542_p5 }
  0x18   :  { %552 = shalt.err (!%p549_p9)
}
  0x19   :  { %25 = dma.hbm_to_vmem [thread:$0]  %s727_s0, 128, %s23_s9, [#allocation3]  }
  0x1a   :  { %s561_s15 = scalar_lea.vmem %s46_s11, 1024  ;;  %p566_p11 = scmp.lt.s32.totalorder %s46_s11, %s46_s11 }
  0x1b   :  { %p562_p10 = scmp.ne.s32.totalorder %s46_s11, %s561_s15  ;;  %p567_p12 = scmp.lt.s32.totalorder %s561_s15, %s561_s15 }
  0x1d   :  { %p568_p13 = por %p567_p12, %p566_p11 }
  0x1f   :  { %p569_p0 = pnand %p568_p13, %p562_p10 }
  0x21   :  { %572 = shalt.err (!%p569_p0)
}
  0x22   :  { %51 = dma.hbm_to_vmem [thread:$0]  %s730_s3, 1024, %s46_s11, [#allocation6], %s622_s27, %s622_s27, %s623_s28  }
  0x23   :  { %s626_s17 = smov [#allocation8]  }
  0x24   :  { %s59_s18 = sshll.u32 %s626_s17, 4  ;;  %s60_s18 = int_to_ptr.vmem [resolvable:$true] %s59_s18 }
  0x25   :  { %s581_s19 = scalar_lea.vmem %s60_s18, 1024  ;;  %p586_p2 = scmp.lt.s32.totalorder %s60_s18, %s60_s18 }
  0x26   :  { %p582_p1 = scmp.ne.s32.totalorder %s60_s18, %s581_s19  ;;  %p587_p3 = scmp.lt.s32.totalorder %s581_s19, %s581_s19 }
  0x28   :  { %p588_p4 = por %p587_p3, %p586_p2 }
  0x2a   :  { %p589_p5 = pnand %p588_p4, %p582_p1 }
  0x2c   :  { %592 = shalt.err (!%p589_p5)
}
  0x2d   :  { %65 = dma.hbm_to_vmem [thread:$0]  %s732_s5, 1024, %s60_s18, [#allocation9], %s622_s27, %s622_s27, %s623_s28  }
  0x2e   :  { %613 = dma.done.wait [#allocation3], 128  }
  0x2f   :  { %614 = vsyncadd [#allocation3], 4294967168 }
  0x30   :  { %615 = dma.done.wait [#allocation6], 1280  }
  0x31   :  { %616 = vsyncadd [#allocation6], 4294966016 }
  0x32   :  { %617 = dma.done.wait [#allocation9], 1024  }
  0x33   :  { %618 = vsyncadd [#allocation9], 4294966272  ;;  %v627_v0 = vmov 0.0   ;;  %vm628_vm0 = vmmov 0   ;;  %v495_v1 = vld [vmem:[#allocation5 + $0x8] sm:$0xff]   ;;  %v496_v2 = vld [vmem:[#allocation5] sm:$0xff]  }
  0x34   :  { %438 = vmatprep.subr.bf16.mxu0 %v627_v0  ;;  %442 = vmatprep.mubr.msk.bf16.mxu0 %vm628_vm0, %v627_v0  ;;  %v81_v3 = vld [vmem:[#allocation2] sm:$0xff]  ;;  %v497_v4 = vld [vmem:[#allocation7 + $0x38] sm:$0xff]   ;;  %v498_v6 = vld [vmem:[#allocation7 + $0x30] sm:$0xff]   ;;  %vm106_vm1 = vcmask 261120   ;;  %s629_s24 = smov [#allocation10]   ;;  %vm376_vm2 = vcmask 64512  }
  0x35   :  { %446 = vmatprep.subr.bf16.mxu1 %v627_v0  ;;  %462 = vmatprep.mubr.msk.bf16.mxu1 %vm628_vm0, %v627_v0  ;;  %v82_v5 = vpack.c.bf16 %v81_v3, %v81_v3  ;;  %v499_v7 = vld [vmem:[#allocation7 + $0x28] sm:$0xff]   ;;  %v500_v8 = vld [vmem:[#allocation7 + $0x20] sm:$0xff]   ;;  %v501_v9 = vld [vmem:[#allocation7 + $0x18] sm:$0xff]   ;;  %s384_s25 = sshll.u32 %s629_s24, 4  ;;  %s385_s25 = int_to_ptr.vmem [resolvable:$true] %s384_s25 }
  0x36   :  { %439 = vmatpush3.bf16.msra.mxu0 %v495_v1  ;;  %447 = vmatpush3.bf16.msra.mxu1 %v497_v4  ;;  %v502_v10 = vld [vmem:[#allocation7 + $0x10] sm:$0xff]   ;;  %v503_v11 = vld [vmem:[#allocation7 + $0x8] sm:$0xff]   ;;  %v504_v12 = vld [vmem:[#allocation7] sm:$0xff]   ;;  %p598_p7 = scmp.lt.s32.totalorder %s385_s25, %s385_s25 }
  0x37   :  { %440 = vmatprep.subr.bf16.mxu0 %v627_v0  ;;  %448 = vmatprep.subr.bf16.mxu1 %v627_v0  ;;  %v505_v13 = vld [vmem:[#allocation8 + $0x38] sm:$0xff]   ;;  %v506_v14 = vld [vmem:[#allocation8 + $0x30] sm:$0xff]   ;;  %v507_v15 = vld [vmem:[#allocation8 + $0x28] sm:$0xff]  }
  0x38   :  { %v508_v16 = vld [vmem:[#allocation8 + $0x20] sm:$0xff]   ;;  %v509_v17 = vld [vmem:[#allocation8 + $0x18] sm:$0xff]   ;;  %v510_v18 = vld [vmem:[#allocation8 + $0x10] sm:$0xff]  }
  0x39   :  { %v395_v19 = vld [vmem:[%s729_s2] ss:$0 sm:$0xff]  ;;  %v512_v28 = vld [vmem:[#allocation8] sm:$0xff]  }
  0x3a   :  { %441 = vmatpush3.bf16.msra.mxu0 %v496_v2  ;;  %449 = vmatpush3.bf16.msra.mxu1 %v498_v6  ;;  %v511_v27 = vld [vmem:[#allocation8 + $0x8] sm:$0xff]  }
  0x3b   :  { %466 = vmatprep.subr.bf16.mxu0 %v627_v0  ;;  %450 = vmatprep.subr.bf16.mxu1 %v627_v0  ;;  %v399_v29 = vld [vmem:[%s731_s4] ss:$0 sm:$0xff]  ;;  %s593_s4 = scalar_lea.vmem %s385_s25, 128 }
  0x3c   :  { %v408_v37 = vld [vmem:[%s733_s6] ss:$0 sm:$0xff]  ;;  %p594_p6 = scmp.ne.s32.totalorder %s385_s25, %s593_s4  ;;  %p599_p8 = scmp.lt.s32.totalorder %s593_s4, %s593_s4 }
  0x3d   :  { %443 = vmatmul.mubr.msk.bf16.vlgmr.msra.gmra.mxu0 %vm106_vm1, %v82_v5 }
  0x3e   :  { %482 = vmatprep.mubr.msk.bf16.mxu0 %vm628_vm0, %v627_v0  ;;  %451 = vmatpush3.bf16.msra.mxu1 %v499_v7  ;;  %p600_p9 = por %p599_p8, %p598_p7 }
  0x3f   :  { %452 = vmatprep.subr.bf16.mxu1 %v627_v0  ;;  %467 = vmatpush3.bf16.msra.mxu0 %v505_v13 }
  0x40   :  { %468 = vmatprep.subr.bf16.mxu0 %v627_v0  ;;  %p601_p10 = pnand %p600_p9, %p594_p6 }
  0x42   :  { %453 = vmatpush3.bf16.msra.mxu1 %v500_v8 }
  0x43   :  { %454 = vmatprep.subr.bf16.mxu1 %v627_v0  ;;  %469 = vmatpush3.bf16.msra.mxu0 %v506_v14 }
  0x44   :  { %470 = vmatprep.subr.bf16.mxu0 %v627_v0 }
  0x46   :  { %455 = vmatpush3.bf16.msra.mxu1 %v501_v9 }
  0x47   :  { %456 = vmatprep.subr.bf16.mxu1 %v627_v0  ;;  %471 = vmatpush3.bf16.msra.mxu0 %v507_v15 }
  0x48   :  { %472 = vmatprep.subr.bf16.mxu0 %v627_v0 }
  0x4a   :  { %457 = vmatpush3.bf16.msra.mxu1 %v502_v10 }
  0x4b   :  { %458 = vmatprep.subr.bf16.mxu1 %v627_v0  ;;  %473 = vmatpush3.bf16.msra.mxu0 %v508_v16 }
  0x4c   :  { %474 = vmatprep.subr.bf16.mxu0 %v627_v0 }
  0x4e   :  { %459 = vmatpush3.bf16.msra.mxu1 %v503_v11 }
  0x4f   :  { %460 = vmatprep.subr.bf16.mxu1 %v627_v0  ;;  %475 = vmatpush3.bf16.msra.mxu0 %v509_v17 }
  0x50   :  { %476 = vmatprep.subr.bf16.mxu0 %v627_v0 }
  0x52   :  { %461 = vmatpush3.bf16.msra.mxu1 %v504_v12 }
  0x53   :  { %477 = vmatpush3.bf16.msra.mxu0 %v510_v18 }
  0x54   :  { %478 = vmatprep.subr.bf16.mxu0 %v627_v0 }
  0x57   :  { %479 = vmatpush3.bf16.msra.mxu0 %v511_v27 }
  0x58   :  { %480 = vmatprep.subr.bf16.mxu0 %v627_v0 }
  0x5b   :  { %481 = vmatpush3.bf16.msra.mxu0 %v512_v28 }
  0xfd   :  { %v144_v20 = vpop.f32.mrf.mxu0 }
  0xfe   :  { %v145_v21 = vadd.f32 %v395_v19, %v144_v20 }
  0xff   :  { %v444_v22 = vpop.f32.mrf.mxu0 }
 0x100   :  { %v150_v23 = vmax.f32 %v145_v21, 0.0 }
 0x101   :  { %v147_v24 = vpop.f32.mrf.mxu0 }
 0x102   :  { %v151_v25 = vpack.c.bf16 %v150_v23, %v150_v23 }
 0x103   :  { %v445_v26 = vpop.f32.mrf.mxu0 }
 0x104   :  { %463 = vmatmul.mubr.bf16.vlgmr.msra.gmra.mxu1 %v151_v25 }
 0x1c4   :  { %v257_v30 = vpop.f32.mrf.mxu1 }
 0x1c5   :  { %v258_v31 = vadd.f32 %v399_v29, %v257_v30 }
 0x1c6   :  { %v464_v32 = vpop.f32.mrf.mxu1 }
 0x1c7   :  { %v263_v33 = vmax.f32 %v258_v31, 0.0 }
 0x1c8   :  { %v260_v34 = vpop.f32.mrf.mxu1 }
 0x1c9   :  { %v264_v35 = vpack.c.bf16 %v263_v33, %v263_v33 }
 0x1ca   :  { %v465_v36 = vpop.f32.mrf.mxu1 }
 0x1cb   :  { %483 = vmatmul.mubr.bf16.vlgmr.msra.gmra.mxu0 %v264_v35 }
 0x28b   :  { %v370_v38 = vpop.f32.mrf.mxu0 }
 0x28c   :  { %v371_v39 = vadd.f32 %v408_v37, %v370_v38 }
 0x28d   :  { %v484_v40 = vpop.f32.mrf.mxu0 }
 0x28e   :  { %377 = vst.msk [vmem:[#allocation10] sm:$0xff] %vm376_vm2, %v371_v39 }
 0x28f   :  { %v373_v41 = vpop.f32.mrf.mxu0 }
 0x290   :  { %604 = shalt.err (!%p601_p10)
}
 0x291   :  { %387 = dma.vmem_to_hbm [thread:$0]  %s385_s25, 128, %s734_s7, [#allocation4]   ;;  %v485_v42 = vpop.f32.mrf.mxu0 }
 0x292   :  { %619 = dma.done.wait [#allocation4], 128  }
 0x293   :  { %620 = vsyncadd [#allocation4], 4294967168 }
 0x294   :  { %391 = vsyncpa [#allocation3], 1 }
 0x295   :  { %392 = vsyncpa [#allocation6], 1 }
 0x296   :  { %393 = vsyncpa [#allocation9], 1 }
 0x297   :  { %394 = vsyncpa [#allocation4], 1 }

</bundles_post_ra>
